<compile_context>
chip_gen: v7x
topology: tpu7x:2x2x1
jax: 0.10.0
libtpu: 0.0.40
codegen_flags: <defaults>
</compile_context>

<pallas_src>
import numpy as np
import jax
import jax.numpy as jnp
from jax import lax
from jax.experimental import pallas as pl
from jax.experimental.pallas import tpu as pltpu

# ---------------- problem sizes (synthetic, deterministic) ----------------
B = 16        # number of query embeddings (batch)
D = 32        # embedding dim
N = 64        # number of few-shot training embeddings
C = 8         # number of classes
K = 5         # n_neighbors (module default is 33; small here for small N)
NPAD = 128    # support axis padded to one full f32 vreg of lanes
CPAD = 128    # class axis padded so the output store is lane-dense
D_SUP = D + 8 # support rows: D rows of -2*X^T, row D = ||x||^2, rest zero pad


def knn_predict_proba_kernel(q_ref, sup_ref, yoh_ref, out_ref):
    """Whole-batch KNN predict_proba in one invocation (no grid).

    q_ref   : (B, D)          f32 queries
    sup_ref : (D_SUP, NPAD)   f32; rows [0,D) = -2 * X^T (zero-padded cols),
                              row D = ||x_n||^2 (+inf for padding cols n >= N)
    yoh_ref : (NPAD, CPAD)    bf16 one-hot support labels (zero pads)
    out_ref : (B, CPAD)       f32 class probabilities (cols >= C are 0)
    """
    q = q_ref[...]                                   # (B, D)
    xm2t = sup_ref[0:D, :]                           # (D, NPAD)  = -2 * X^T
    xsq = sup_ref[D:D + 1, :]                        # (1, NPAD)  = ||x||^2 (+inf pads)

    # Distance surrogate (per-row constant ||q||^2 dropped; top-K invariant):
    #   dist[b, n] = ||x_n||^2 - 2 * q_b . x_n       (padding cols -> +inf)
    dist = jnp.dot(q, xm2t, preferred_element_type=jnp.float32) + xsq   # (B, NPAD)

    # Iterative top-K: one XLU lane-reduce (min) per iteration; the winner is
    # recovered by exact-equality against the min, counted into the vote mask,
    # and knocked out with +inf for the next round.
    def body(_, carry):
        d, mask = carry
        m = jnp.min(d, axis=-1, keepdims=True)        # (B, 1)  single lane reduce
        sel = d == m                                  # (B, NPAD)
        mask = mask + sel.astype(jnp.float32)
        d = jnp.where(sel, jnp.inf, d)
        return d, mask

    _, nbr_mask = lax.fori_loop(
        0, K, body, (dist, jnp.zeros_like(dist)), unroll=True)

    # Vote: bf16 mask x bf16 one-hot on the MXU, f32 accumulate (exact counts).
    votes = jnp.dot(nbr_mask.astype(jnp.bfloat16), yoh_ref[...],
                    preferred_element_type=jnp.float32)               # (B, CPAD)
    out_ref[...] = votes * (1.0 / K)                  # normalization stays in f32


def prepare_support(x_train, y_train, n_classes):
    """One-time setup (the analogue of clsf.fit): fold -2*X^T, ||x||^2 and the
    padding-column mask into a single f32 support tensor; bf16 one-hot labels."""
    n, d = x_train.shape
    x32 = x_train.astype(jnp.float32)
    xsq = jnp.sum(x32 * x32, axis=-1)                                  # (n,)

    sup = jnp.zeros((D_SUP, NPAD), jnp.float32)
    sup = sup.at[:d, :n].set(-2.0 * x32.T)             # -2 scale folded at fit time
    sup = sup.at[d, :n].set(xsq)                       # ||x||^2 precomputed at fit time
    sup = sup.at[d, n:].set(jnp.inf)                   # padding cols never selected

    yoh = jnp.zeros((NPAD, CPAD), jnp.bfloat16).at[:n, :n_classes].set(
        jax.nn.one_hot(y_train, n_classes, dtype=jnp.bfloat16))
    return sup, yoh


def few_shot_predict_proba(z_image, sup_pad, yoh_pad):
    """scores = KNN(K).predict_proba(z_image) given prepared support tensors."""
    out = pl.pallas_call(
        knn_predict_proba_kernel,
        out_shape=jax.ShapeDtypeStruct((B, CPAD), jnp.float32),
        in_specs=[
            pl.BlockSpec(memory_space=pltpu.MemorySpace.VMEM),   # queries
            pl.BlockSpec(memory_space=pltpu.MemorySpace.VMEM),   # fused support tensor
            pl.BlockSpec(memory_space=pltpu.MemorySpace.VMEM),   # one-hot labels (bf16)
        ],
        out_specs=pl.BlockSpec(memory_space=pltpu.MemorySpace.VMEM),
    )(z_image, sup_pad, yoh_pad)
    return out[:, :C]    # layout plumbing back to (B, n_classes)


def _reference(z_image, x_train, y_train):
    """Pure-numpy uniform-weight KNN predict_proba."""
    z = np.asarray(z_image, np.float32)
    x = np.asarray(x_train, np.float32)
    d = ((z[:, None, :] - x[None, :, :]) ** 2).sum(-1)                 # (B, N)
    order = np.argsort(d, axis=-1, kind="stable")[:, :K]               # (B, K)
    probs = np.zeros((z.shape[0], C), np.float32)
    for b in range(z.shape[0]):
        for n in order[b]:
            probs[b, y_train[n]] += 1.0 / K
    return probs


if __name__ == "__main__":
    key = jax.random.PRNGKey(0)
    k1, k2, k3 = jax.random.split(key, 3)

    # Deterministic synthetic "checkpoint": few-shot support set + labels.
    x_train = jax.random.normal(k1, (N, D), dtype=jnp.float32)
    y_train = jax.random.randint(k2, (N,), 0, C, dtype=jnp.int32)

    # Query embeddings (Z_image).
    z_image = jax.random.normal(k3, (B, D), dtype=jnp.float32)

    sup_pad, yoh_pad = prepare_support(x_train, y_train, C)

    scores = few_shot_predict_proba(z_image, sup_pad, yoh_pad)
    scores = jax.block_until_ready(scores)

    ref = _reference(np.asarray(z_image), np.asarray(x_train), np.asarray(y_train))
    np.testing.assert_allclose(np.asarray(scores), ref, rtol=1e-5, atol=1e-5)

    print("KERNEL_OK")
</pallas_src>

<mosaic_0001>
module attributes {stable_mosaic.version = 11 : i64} {
  func.func @knn_predict_proba_kernel(%arg0: memref<16x32xf32, #tpu.memory_space<vmem>>, %arg1: memref<40x128xf32, #tpu.memory_space<vmem>>, %arg2: memref<128x128xbf16, #tpu.memory_space<vmem>>, %arg3: memref<16x128xf32, #tpu.memory_space<vmem>>) attributes {dimension_semantics = [], scalar_prefetch = 0 : i64, scratch_operands = 0 : i64, tpu.core_type = #tpu.core_type<tc>} {
    %c0 = arith.constant 0 : index
    %c0_0 = arith.constant 0 : index
    %0 = vector.load %arg0[%c0, %c0_0] : memref<16x32xf32, #tpu.memory_space<vmem>>, vector<16x32xf32>
    %c0_1 = arith.constant 0 : index
    %c0_2 = arith.constant 0 : index
    %1 = vector.load %arg1[%c0_1, %c0_2] : memref<40x128xf32, #tpu.memory_space<vmem>>, vector<32x128xf32>
    %c32 = arith.constant 32 : index
    %c0_3 = arith.constant 0 : index
    %2 = vector.load %arg1[%c32, %c0_3] : memref<40x128xf32, #tpu.memory_space<vmem>>, vector<1x128xf32>
    %cst = arith.constant dense<0.000000e+00> : vector<16x128xf32>
    %3 = tpu.matmul %0, %1, %cst {dimension_numbers = #tpu.dot_dimension_numbers<[1], [0], [0], [1], [0, 0, 1, 1], [], []>} : vector<16x32xf32>, vector<32x128xf32>, vector<16x128xf32> -> vector<16x128xf32>
    %4 = vector.broadcast %2 : vector<1x128xf32> to vector<16x128xf32>
    %5 = arith.addf %3, %4 : vector<16x128xf32>
    %cst_4 = arith.constant 0.000000e+00 : f32
    %6 = vector.broadcast %cst_4 : f32 to vector<16x128xf32>
    %c0_i32 = arith.constant 0 : i32
    %cst_5 = arith.constant dense<0x7F800000> : vector<16xf32>
    %7 = vector.multi_reduction <minimumf>, %5, %cst_5 [1] : vector<16x128xf32> to vector<16xf32>
    %8 = vector.shape_cast %7 : vector<16xf32> to vector<16x1xf32>
    %9 = vector.broadcast %8 : vector<16x1xf32> to vector<16x128xf32>
    %10 = arith.cmpf oeq, %5, %9 : vector<16x128xf32>
    %11 = arith.extui %10 : vector<16x128xi1> to vector<16x128xi32>
    %12 = arith.sitofp %11 : vector<16x128xi32> to vector<16x128xf32>
    %13 = arith.addf %6, %12 : vector<16x128xf32>
    %cst_6 = arith.constant 0x7F800000 : f32
    %14 = vector.broadcast %cst_6 : f32 to vector<16x128xf32>
    %15 = arith.select %10, %14, %5 : vector<16x128xi1>, vector<16x128xf32>
    %c1_i32 = arith.constant 1 : i32
    %cst_7 = arith.constant dense<0x7F800000> : vector<16xf32>
    %16 = vector.multi_reduction <minimumf>, %15, %cst_7 [1] : vector<16x128xf32> to vector<16xf32>
    %17 = vector.shape_cast %16 : vector<16xf32> to vector<16x1xf32>
    %18 = vector.broadcast %17 : vector<16x1xf32> to vector<16x128xf32>
    %19 = arith.cmpf oeq, %15, %18 : vector<16x128xf32>
    %20 = arith.extui %19 : vector<16x128xi1> to vector<16x128xi32>
    %21 = arith.sitofp %20 : vector<16x128xi32> to vector<16x128xf32>
    %22 = arith.addf %13, %21 : vector<16x128xf32>
    %cst_8 = arith.constant 0x7F800000 : f32
    %23 = vector.broadcast %cst_8 : f32 to vector<16x128xf32>
    %24 = arith.select %19, %23, %15 : vector<16x128xi1>, vector<16x128xf32>
    %c2_i32 = arith.constant 2 : i32
    %cst_9 = arith.constant dense<0x7F800000> : vector<16xf32>
    %25 = vector.multi_reduction <minimumf>, %24, %cst_9 [1] : vector<16x128xf32> to vector<16xf32>
    %26 = vector.shape_cast %25 : vector<16xf32> to vector<16x1xf32>
    %27 = vector.broadcast %26 : vector<16x1xf32> to vector<16x128xf32>
    %28 = arith.cmpf oeq, %24, %27 : vector<16x128xf32>
    %29 = arith.extui %28 : vector<16x128xi1> to vector<16x128xi32>
    %30 = arith.sitofp %29 : vector<16x128xi32> to vector<16x128xf32>
    %31 = arith.addf %22, %30 : vector<16x128xf32>
    %cst_10 = arith.constant 0x7F800000 : f32
    %32 = vector.broadcast %cst_10 : f32 to vector<16x128xf32>
    %33 = arith.select %28, %32, %24 : vector<16x128xi1>, vector<16x128xf32>
    %c3_i32 = arith.constant 3 : i32
    %cst_11 = arith.constant dense<0x7F800000> : vector<16xf32>
    %34 = vector.multi_reduction <minimumf>, %33, %cst_11 [1] : vector<16x128xf32> to vector<16xf32>
    %35 = vector.shape_cast %34 : vector<16xf32> to vector<16x1xf32>
    %36 = vector.broadcast %35 : vector<16x1xf32> to vector<16x128xf32>
    %37 = arith.cmpf oeq, %33, %36 : vector<16x128xf32>
    %38 = arith.extui %37 : vector<16x128xi1> to vector<16x128xi32>
    %39 = arith.sitofp %38 : vector<16x128xi32> to vector<16x128xf32>
    %40 = arith.addf %31, %39 : vector<16x128xf32>
    %cst_12 = arith.constant 0x7F800000 : f32
    %41 = vector.broadcast %cst_12 : f32 to vector<16x128xf32>
    %42 = arith.select %37, %41, %33 : vector<16x128xi1>, vector<16x128xf32>
    %c4_i32 = arith.constant 4 : i32
    %cst_13 = arith.constant dense<0x7F800000> : vector<16xf32>
    %43 = vector.multi_reduction <minimumf>, %42, %cst_13 [1] : vector<16x128xf32> to vector<16xf32>
    %44 = vector.shape_cast %43 : vector<16xf32> to vector<16x1xf32>
    %45 = vector.broadcast %44 : vector<16x1xf32> to vector<16x128xf32>
    %46 = arith.cmpf oeq, %42, %45 : vector<16x128xf32>
    %47 = arith.extui %46 : vector<16x128xi1> to vector<16x128xi32>
    %48 = arith.sitofp %47 : vector<16x128xi32> to vector<16x128xf32>
    %49 = arith.addf %40, %48 : vector<16x128xf32>
    %cst_14 = arith.constant 0x7F800000 : f32
    %50 = vector.broadcast %cst_14 : f32 to vector<16x128xf32>
    %51 = arith.select %46, %50, %42 : vector<16x128xi1>, vector<16x128xf32>
    %52 = arith.truncf %49 : vector<16x128xf32> to vector<16x128xbf16>
    %c0_15 = arith.constant 0 : index
    %c0_16 = arith.constant 0 : index
    %53 = vector.load %arg2[%c0_15, %c0_16] : memref<128x128xbf16, #tpu.memory_space<vmem>>, vector<128x128xbf16>
    %cst_17 = arith.constant dense<0.000000e+00> : vector<16x128xf32>
    %54 = tpu.matmul %52, %53, %cst_17 {dimension_numbers = #tpu.dot_dimension_numbers<[1], [0], [0], [1], [0, 0, 1, 1], [], []>} : vector<16x128xbf16>, vector<128x128xbf16>, vector<16x128xf32> -> vector<16x128xf32>
    %cst_18 = arith.constant 2.000000e-01 : f32
    %55 = vector.broadcast %cst_18 : f32 to vector<16x128xf32>
    %56 = arith.mulf %54, %55 : vector<16x128xf32>
    %c0_19 = arith.constant 0 : index
    %c0_20 = arith.constant 0 : index
    %57 = vector.load %arg3[%c0_19, %c0_20] : memref<16x128xf32, #tpu.memory_space<vmem>>, vector<16x128xf32>
    tpu.vector_store %arg3[%c0_19, %c0_20], %56 {strides = array<i32>} : memref<16x128xf32, #tpu.memory_space<vmem>>, vector<16x128xf32>,
    return
  }
}

</mosaic_0001>

<bundles_post_ra>
// kernel: tpu_custom_call.1
= control target key start
LH: loop header
LB: loop body
LE: loop exit
PB: predicated region body
PF: predicated region fallthrough
CT: control target
= control target key end

     0   :  { %8 = vsyncpa [#allocation3], 0  ;;  %s646_s0 = inlined_call_operand.hbm [shape: f32[16,32], index: 0, kind: input, shape index: {}]   ;;  %s647_s1 = inlined_call_operand.hbm [shape: f32[40,128], index: 1, kind: input, shape index: {}]   ;;  %s648_s2 = inlined_call_operand.hbm [shape: bf16[128,128], index: 2, kind: input, shape index: {}]   ;;  %s649_s3 = inlined_call_operand.hbm [shape: f32[16,128], index: 3, kind: output, shape index: {}]  }
   0x1   :  { %9 = vsyncpa [#allocation6], 0 }
   0x2   :  { %10 = vsyncpa [#allocation4], 0  ;;  %s533_s12 = smov [#allocation5]   ;;  %s534_s14 = smov [#allocation2]  }
   0x3   :  { %s28_s13 = sshll.u32 %s533_s12, 4  ;;  %s16_s15 = sshll.u32 %s534_s14, 4  ;;  %s29_s13 = int_to_ptr.vmem [resolvable:$true] %s28_s13  ;;  %s563_s15 = int_to_ptr.vmem [resolvable:$true] %s16_s15 }
   0x4   :  { %s439_s18 = scalar_lea.hbm %s647_s1, 640 }
   0x5   :  { %p440_p0 = scmp.ne.s32.totalorder %s647_s1, %s439_s18  ;;  %p443_p1 = scmp.lt.u32.totalorder %s439_s18, %s647_s1 }
   0x7   :  { %p445_p2 = pnand %p443_p1, %p440_p0 }
   0x9   :  { %448 = shalt.err (!%p445_p2)
}
   0xa   :  { %s449_s23 = scalar_lea.vmem %s29_s13, 640  ;;  %p454_p4 = scmp.lt.s32.totalorder %s29_s13, %s29_s13 }
   0xb   :  { %p450_p3 = scmp.ne.s32.totalorder %s29_s13, %s449_s23  ;;  %p455_p5 = scmp.lt.s32.totalorder %s449_s23, %s449_s23 }
   0xd   :  { %p456_p6 = por %p455_p5, %p454_p4 }
   0xf   :  { %p457_p7 = pnand %p456_p6, %p450_p3 }
  0x11   :  { %460 = shalt.err (!%p457_p7)
}
  0x12   :  { %s535_s24 = smov 128   ;;  %s536_s25 = smov 8  }
  0x13   :  { %34 = dma.hbm_to_vmem [thread:$0]  %s647_s1, 640, %s29_s13, [#allocation6], %s535_s24, %s535_s24, %s536_s25  }
  0x14   :  { %s461_s30 = scalar_lea.hbm %s646_s0, 256 }
  0x15   :  { %p462_p8 = scmp.ne.s32.totalorder %s646_s0, %s461_s30  ;;  %p465_p9 = scmp.lt.u32.totalorder %s461_s30, %s646_s0 }
  0x17   :  { %p467_p10 = pnand %p465_p9, %p462_p8 }
  0x19   :  { %470 = shalt.err (!%p467_p10)
}
  0x1a   :  { %s471_s8 = scalar_lea.vmem %s563_s15, 256  ;;  %p476_p12 = scmp.lt.s32.totalorder %s563_s15, %s563_s15 }
  0x1b   :  { %p472_p11 = scmp.ne.s32.totalorder %s563_s15, %s471_s8  ;;  %p477_p13 = scmp.lt.s32.totalorder %s471_s8, %s471_s8 }
  0x1d   :  { %p478_p0 = por %p477_p13, %p476_p12 }
  0x1f   :  { %p479_p1 = pnand %p478_p0, %p472_p11 }
  0x21   :  { %482 = shalt.err (!%p479_p1)
}
  0x22   :  { %22 = dma.hbm_to_vmem [thread:$0]  %s646_s0, 256, %s563_s15, [#allocation3], %s535_s24, %s535_s24, %s536_s25  }
  0x23   :  { %s537_s10 = smov [#allocation7]   ;;  %s483_s14 = scalar_lea.hbm %s648_s2, 1024 }
  0x24   :  { %s40_s11 = sshll.u32 %s537_s10, 4  ;;  %p484_p2 = scmp.ne.s32.totalorder %s648_s2, %s483_s14  ;;  %s41_s11 = int_to_ptr.vmem [resolvable:$true] %s40_s11 }
  0x25   :  { %p487_p3 = scmp.lt.u32.totalorder %s483_s14, %s648_s2 }
  0x27   :  { %p489_p4 = pnand %p487_p3, %p484_p2 }
  0x29   :  { %492 = shalt.err (!%p489_p4)
}
  0x2a   :  { %s493_s20 = scalar_lea.vmem %s41_s11, 1024  ;;  %p498_p6 = scmp.lt.s32.totalorder %s41_s11, %s41_s11 }
  0x2b   :  { %p494_p5 = scmp.ne.s32.totalorder %s41_s11, %s493_s20  ;;  %p499_p7 = scmp.lt.s32.totalorder %s493_s20, %s493_s20 }
  0x2d   :  { %p500_p8 = por %p499_p7, %p498_p6 }
  0x2f   :  { %p501_p9 = pnand %p500_p8, %p494_p5 }
  0x31   :  { %504 = shalt.err (!%p501_p9)
}
  0x32   :  { %s538_s0 = smov 64   ;;  %s539_s15 = smov 4  }
  0x33   :  { %46 = dma.hbm_to_vmem [thread:$0]  %s648_s2, 1024, %s41_s11, [#allocation6], %s538_s0, %s538_s0, %s539_s15  }
  0x34   :  { %527 = dma.done.wait [#allocation3], 256  }
  0x35   :  { %528 = vsyncadd [#allocation3], 4294967040 }
  0x36   :  { %529 = dma.done.wait [#allocation6], 1664  }
  0x37   :  { %530 = vsyncadd [#allocation6], 4294965632  ;;  %vm68_vm0 = vcmask 261120   ;;  %v59_v0 = vld [vmem:[#allocation5] sm:$0xff]  ;;  %v60_v1 = vld [vmem:[#allocation5 + $0x8] sm:$0xff]  ;;  %v540_v8 = vmov 0.0  }
  0x38   :  { %v61_v2 = vld [vmem:[#allocation5 + $0x10] sm:$0xff]  ;;  %v413_v3 = vpack.c.bf16 %v60_v1, %v59_v0  ;;  %v62_v4 = vld [vmem:[#allocation5 + $0x18] sm:$0xff]  ;;  %393 = vmatprep.subr.bf16.mxu1 %v540_v8  ;;  %v346_v9 = vld [vmem:[#allocation5 + $0x20] ss:$0 sm:$0xff]  ;;  %vm541_vm9 = vmmov 0   ;;  %s542_s2 = smov [#allocation8]  }
  0x39   :  { %v57_v5 = vld [vmem:[#allocation2] sm:$0xff]  ;;  %v417_v6 = vpack.c.bf16 %v62_v4, %v61_v2  ;;  %v58_v7 = vld [vmem:[#allocation2 + $0x8] sm:$0xff]  ;;  %v431_v36 = vld [vmem:[#allocation7] sm:$0xff]   ;;  %409 = vmatprep.mubr.msk.bf16.mxu1 %vm541_vm9, %v540_v8  ;;  %s333_s23 = sshll.u32 %s542_s2, 4  ;;  %s334_s23 = int_to_ptr.vmem [resolvable:$true] %s333_s23 }
  0x3a   :  { %390 = vmatprep.mubr.msk.f32.mxu0 %vm68_vm0, %v57_v5  ;;  %414 = vmatprep.subr.bf16.mxu0 %v413_v3  ;;  %v432_v37 = vld [vmem:[#allocation7 + $0x8] sm:$0xff]   ;;  %v433_v38 = vld [vmem:[#allocation7 + $0x10] sm:$0xff]   ;;  %v434_v39 = vld [vmem:[#allocation7 + $0x18] sm:$0xff]   ;;  %s505_s26 = scalar_lea.vmem %s334_s23, 256  ;;  %p510_p11 = scmp.lt.s32.totalorder %s334_s23, %s334_s23 }
  0x3b   :  { %416 = vmatpush3.bf16.msra.mxu0 %v413_v3  ;;  %394 = vmatpush3.bf16.msra.mxu1 %v431_v36  ;;  %v435_v40 = vld [vmem:[#allocation7 + $0x20] sm:$0xff]   ;;  %v436_v41 = vld [vmem:[#allocation7 + $0x28] sm:$0xff]   ;;  %v437_v50 = vld [vmem:[#allocation7 + $0x30] sm:$0xff]   ;;  %p506_p10 = scmp.ne.s32.totalorder %s334_s23, %s505_s26  ;;  %p511_p12 = scmp.lt.s32.totalorder %s505_s26, %s505_s26 }
  0x3c   :  { %418 = vmatprep.subr.bf16.mxu0 %v417_v6  ;;  %395 = vmatprep.subr.bf16.mxu1 %v540_v8  ;;  %v438_v51 = vld [vmem:[#allocation7 + $0x38] sm:$0xff]  }
  0x3d   :  { %p512_p13 = por %p511_p12, %p510_p11 }
  0x3f   :  { %420 = vmatpush3.bf16.msra.mxu0 %v417_v6  ;;  %396 = vmatpush3.bf16.msra.mxu1 %v432_v37  ;;  %p513_p0 = pnand %p512_p13, %p506_p10 }
  0x40   :  { %397 = vmatprep.subr.bf16.mxu1 %v540_v8 }
  0x42   :  { %391 = vmatmul.mubr.msk.f32.vlgmr.msra.gmra.mrb[0].mxu0 %vm68_vm0, %v58_v7 }
  0x43   :  { %398 = vmatpush3.bf16.msra.mxu1 %v433_v38 }
  0x44   :  { %399 = vmatprep.subr.bf16.mxu1 %v540_v8 }
  0x47   :  { %400 = vmatpush3.bf16.msra.mxu1 %v434_v39 }
  0x48   :  { %401 = vmatprep.subr.bf16.mxu1 %v540_v8 }
  0x4b   :  { %402 = vmatpush3.bf16.msra.mxu1 %v435_v40 }
  0x4c   :  { %403 = vmatprep.subr.bf16.mxu1 %v540_v8 }
  0x4f   :  { %404 = vmatpush3.bf16.msra.mxu1 %v436_v41 }
  0x50   :  { %405 = vmatprep.subr.bf16.mxu1 %v540_v8 }
  0x53   :  { %406 = vmatpush3.bf16.msra.mxu1 %v437_v50 }
  0x54   :  { %407 = vmatprep.subr.bf16.mxu1 %v540_v8 }
  0x57   :  { %408 = vmatpush3.bf16.msra.mxu1 %v438_v51 }
 0x115   :  { %v392_v10 = vpop.f32.mrb[0].mxu0 }
 0x116   :  { %v141_v11 = vpop.f32.mrb[1].mxu0  ;;  %v147_v13 = vadd.f32 %v392_v10, %v346_v9 }
 0x117   :  { %v142_v12 = vadd.f32 %v346_v9, %v141_v11 }
 0x119   :  { %150 = vmin.xlane.f32.xlu0 %v142_v12 }
 0x11d   :  { %152 = vmin.xlane.f32.xlu0 %v147_v13 }
 0x1a6   :  { %v151_v14 = vpop.xlane.xlu0 %150 }
 0x1a7   :  { %vm154_vm1 = vcmp.eq.f32.partialorder %v142_v12, %v151_v14 }
 0x1a8   :  { %v162_v15 = vsel %vm154_vm1, inf, %v142_v12  ;;  %v349_v19 = vsel %vm154_vm1, 1.0, %v540_v8 }
 0x1a9   :  { %164 = vmin.xlane.f32.xlu1 %v162_v15 }
 0x1aa   :  { %v153_v16 = vpop.xlane.xlu0 %152 }
 0x1ab   :  { %vm155_vm2 = vcmp.eq.f32.partialorder %v147_v13, %v153_v16 }
 0x1ac   :  { %v163_v17 = vsel %vm155_vm2, inf, %v147_v13  ;;  %v350_v24 = vsel %vm155_vm2, 1.0, %v540_v8 }
 0x1ad   :  { %166 = vmin.xlane.f32.xlu1 %v163_v17 }
 0x236   :  { %v165_v18 = vpop.xlane.xlu1 %164 }
 0x237   :  { %vm168_vm3 = vcmp.eq.f32.partialorder %v162_v15, %v165_v18 }
 0x238   :  { %v351_v20 = vsel %vm168_vm3, 1.0, %v540_v8  ;;  %v176_v21 = vsel %vm168_vm3, inf, %v162_v15 }
 0x239   :  { %v174_v22 = vadd.f32 %v351_v20, %v349_v19  ;;  %178 = vmin.xlane.f32.xlu0 %v176_v21 }
 0x23a   :  { %v167_v23 = vpop.xlane.xlu1 %166 }
 0x23b   :  { %vm169_vm4 = vcmp.eq.f32.partialorder %v163_v17, %v167_v23 }
 0x23c   :  { %v352_v25 = vsel %vm169_vm4, 1.0, %v540_v8  ;;  %v177_v26 = vsel %vm169_vm4, inf, %v163_v17 }
 0x23d   :  { %v175_v27 = vadd.f32 %v352_v25, %v350_v24  ;;  %180 = vmin.xlane.f32.xlu1 %v177_v26 }
 0x2c6   :  { %v179_v28 = vpop.xlane.xlu0 %178 }
 0x2c7   :  { %vm182_vm5 = vcmp.eq.f32.partialorder %v176_v21, %v179_v28 }
 0x2c8   :  { %v353_v29 = vsel %vm182_vm5, 1.0, %v540_v8  ;;  %v190_v30 = vsel %vm182_vm5, inf, %v176_v21 }
 0x2c9   :  { %v188_v31 = vadd.f32 %v353_v29, %v174_v22  ;;  %192 = vmin.xlane.f32.xlu0 %v190_v30 }
 0x2ca   :  { %v181_v32 = vpop.xlane.xlu1 %180 }
 0x2cb   :  { %vm183_vm6 = vcmp.eq.f32.partialorder %v177_v26, %v181_v32 }
 0x2cc   :  { %v354_v33 = vsel %vm183_vm6, 1.0, %v540_v8  ;;  %v191_v34 = vsel %vm183_vm6, inf, %v177_v26 }
 0x2cd   :  { %v189_v35 = vadd.f32 %v354_v33, %v175_v27  ;;  %194 = vmin.xlane.f32.xlu1 %v191_v34 }
 0x356   :  { %v193_v42 = vpop.xlane.xlu0 %192 }
 0x357   :  { %vm196_vm7 = vcmp.eq.f32.partialorder %v190_v30, %v193_v42 }
 0x358   :  { %v355_v43 = vsel %vm196_vm7, 1.0, %v540_v8  ;;  %v204_v44 = vsel %vm196_vm7, inf, %v190_v30 }
 0x359   :  { %v202_v45 = vadd.f32 %v355_v43, %v188_v31  ;;  %206 = vmin.xlane.f32.xlu0 %v204_v44 }
 0x35a   :  { %v195_v46 = vpop.xlane.xlu1 %194 }
 0x35b   :  { %vm197_vm8 = vcmp.eq.f32.partialorder %v191_v34, %v195_v46 }
 0x35c   :  { %v356_v47 = vsel %vm197_vm8, 1.0, %v540_v8  ;;  %v205_v48 = vsel %vm197_vm8, inf, %v191_v34 }
 0x35d   :  { %v203_v49 = vadd.f32 %v356_v47, %v189_v35  ;;  %208 = vmin.xlane.f32.xlu1 %v205_v48 }
 0x3e6   :  { %v207_v52 = vpop.xlane.xlu0 %206 }
 0x3e7   :  { %vm210_vm10 = vcmp.eq.f32.partialorder %v204_v44, %v207_v52 }
 0x3e8   :  { %v357_v53 = vsel %vm210_vm10, 1.0, %v540_v8 }
 0x3e9   :  { %v216_v56 = vadd.f32 %v357_v53, %v202_v45 }
 0x3ea   :  { %v209_v54 = vpop.xlane.xlu1 %208 }
 0x3eb   :  { %vm211_vm11 = vcmp.eq.f32.partialorder %v205_v48, %v209_v54 }
 0x3ec   :  { %v358_v55 = vsel %vm211_vm11, 1.0, %v540_v8 }
 0x3ed   :  { %v217_v57 = vadd.f32 %v358_v55, %v203_v49 }
 0x3ef   :  { %v218_v58 = vpack.c.bf16 %v217_v57, %v216_v56 }
 0x3f1   :  { %410 = vmatmul.mubr.bf16.vlgmr.msra.gmra.mrb[0].mxu1 %v218_v58 }
 0x4c4   :  { %v317_v59 = vpop.f32.mrb[0].mxu1 }
 0x4c5   :  { %v324_v60 = vmul.f32 0.2, %v317_v59  ;;  %v411_v61 = vpop.f32.mrb[1].mxu1 }
 0x4c6   :  { %v320_v62 = vpop.f32.mrb[2].mxu1 }
 0x4c7   :  { %326 = vst [vmem:[#allocation8] sm:$0xff] %v324_v60  ;;  %v325_v63 = vmul.f32 0.2, %v320_v62  ;;  %v412_v0 = vpop.f32.mrb[3].mxu1 }
 0x4c9   :  { %327 = vst [vmem:[#allocation8 + $0x8] sm:$0xff] %v325_v63 }
 0x4ca   :  { %516 = shalt.err (!%p513_p0)
}
 0x4cb   :  { %s517_s29 = scalar_lea.hbm %s649_s3, 256 }
 0x4cc   :  { %p518_p1 = scmp.ne.s32.totalorder %s649_s3, %s517_s29  ;;  %p521_p2 = scmp.lt.u32.totalorder %s517_s29, %s649_s3 }
 0x4ce   :  { %p523_p3 = pnand %p521_p2, %p518_p1 }
 0x4d0   :  { %526 = shalt.err (!%p523_p3)
}
 0x4d1   :  { %339 = dma.vmem_to_hbm [thread:$0]  %s334_s23, 256, %s649_s3, [#allocation4], %s535_s24, %s535_s24, %s536_s25  }
 0x4d2   :  { %531 = dma.done.wait [#allocation4], 256  }
 0x4d3   :  { %532 = vsyncadd [#allocation4], 4294967040 }
 0x4d4   :  { %343 = vsyncpa [#allocation3], 1 }
 0x4d5   :  { %344 = vsyncpa [#allocation6], 1 }
 0x4d6   :  { %345 = vsyncpa [#allocation4], 1 }

</bundles_post_ra>
